<compile_context>
chip_gen: v7x
topology: tpu7x:2x2x1
jax: 0.10.0
libtpu: 0.0.40
codegen_flags: <defaults>
</compile_context>

<pallas_src>
import functools

import numpy as np
import jax
import jax.numpy as jnp
from jax.experimental import pallas as pl
from jax.experimental.pallas import tpu as pltpu


# ----------------------------------------------------------------------------
# Pallas kernel: one (TR, TT) tile of rows x time
# ----------------------------------------------------------------------------
def _snake_kernel(x_ref, alpha_ref, o_ref, *, eps):
    # x_ref: (TR, TT) VMEM (I/O dtype), alpha_ref: (TR, 1) f32 VMEM column.
    x = x_ref[...].astype(jnp.float32)      # f32 math (v5e has no bf16 VPU/EUP)
    a = alpha_ref[...]                      # (TR, 1) -> broadcast over time (VPU)
    inv_a = 1.0 / (a + eps)                 # exact divide on a tiny column
    s = jnp.sin(x * a)                      # EUP transcendental
    o_ref[...] = (x + inv_a * (s * s)).astype(o_ref.dtype)


def _round_up(v, m):
    return ((v + m - 1) // m) * m


def _target_block_bytes():
    """~2 MiB blocks on v5e (16 MiB default scoped VMEM), ~4 MiB elsewhere."""
    try:
        kind = jax.devices()[0].device_kind.lower()
    except Exception:
        kind = ""
    if ("v5 lite" in kind) or ("v5e" in kind) or ("v5litepod" in kind):
        return 2 * 1024 * 1024
    return 4 * 1024 * 1024


# ----------------------------------------------------------------------------
# Wrapper: tiling and alpha preprocessing
# ----------------------------------------------------------------------------
def snake(x, alpha, *, alpha_logscale=False, eps=1e-9,
          max_row_tile=256, max_time_tile=None, donate_x=False):
    """x: (B, C, T) f32/bf16, alpha: (C,) -> (B, C, T), same dtype as x."""
    B, C, T = x.shape
    assert alpha.shape == (C,)
    R = B * C
    itemsize = jnp.dtype(x.dtype).itemsize

    # Parameter transform (tiny, once, in the wrapper; mirrors torch.exp).
    a = jnp.exp(alpha) if alpha_logscale else alpha
    a = a.astype(jnp.float32)
    # Per-row alpha column: row (b, c) -> alpha[c].
    a_rows = jnp.tile(a, (B,)).reshape(R, 1)

    x2 = x.reshape(R, T)

    # --- Row tile: multiple of 8 (sublanes) or the full row extent. -----------
    if R <= max_row_tile:
        TR = R                       # full dim is always a legal block extent
    else:
        TR = max_row_tile            # multiple of 8; ragged last block is masked

    # --- Time tile: multiple of 128 (lane-dense stores), sized so a block is
    # ~2-4 MiB; grows when R is small (typical vocoder shapes: few rows, long T).
    if max_time_tile is None:
        tt_cap = max(128, (_target_block_bytes() // (TR * itemsize)) // 128 * 128)
    else:
        tt_cap = max(128, (max_time_tile // 128) * 128)

    t_aligned = _round_up(T, 128)
    if t_aligned <= tt_cap:
        TT = T                       # single time block; full dim is legal
    else:
        TT = tt_cap                  # multiple of 128; ragged last block masked

    grid = (pl.cdiv(R, TR), pl.cdiv(T, TT))   # time is the trailing grid axis

    n = R * T
    cost = pl.CostEstimate(flops=5 * n,
                           transcendentals=n,
                           bytes_accessed=2 * n * itemsize + R * 4)

    out2 = pl.pallas_call(
        functools.partial(_snake_kernel, eps=eps),
        out_shape=jax.ShapeDtypeStruct((R, T), x.dtype),
        grid=grid,
        in_specs=[
            pl.BlockSpec((TR, TT), lambda i, j: (i, j)),
            # alpha block index independent of j -> not re-DMA'd per time tile
            pl.BlockSpec((TR, 1), lambda i, j: (i, 0)),
        ],
        out_specs=pl.BlockSpec((TR, TT), lambda i, j: (i, j)),
        compiler_params=pltpu.CompilerParams(
            dimension_semantics=("parallel", "parallel")),
        cost_estimate=cost,
        input_output_aliases=({0: 0} if donate_x else {}),
    )(x2, a_rows)

    return out2.reshape(B, C, T)


# ----------------------------------------------------------------------------
# Pure-numpy reference (mirrors the PyTorch forward)
# ----------------------------------------------------------------------------
def ref_snake(x, alpha, alpha_logscale=False, eps=1e-9):
    a = np.exp(alpha) if alpha_logscale else alpha
    a = a[None, :, None]
    return x + 1.0 / (a + eps) * np.sin(x * a) ** 2


if __name__ == "__main__":
    B, C, T = 2, 4, 16

    key = jax.random.PRNGKey(0)
    kx, ka = jax.random.split(key)
    x = jax.random.normal(kx, (B, C, T), dtype=jnp.float32)
    alpha = jax.random.uniform(ka, (C,), dtype=jnp.float32,
                               minval=0.5, maxval=2.0)

    # Base path.
    out = jax.block_until_ready(snake(x, alpha))
    ref = ref_snake(np.asarray(x, np.float64), np.asarray(alpha, np.float64))
    assert out.shape == (B, C, T), out.shape
    np.testing.assert_allclose(np.asarray(out), ref, rtol=1e-5, atol=1e-5)

    # Log-scale branch (alpha initialized to zeros in the module).
    alpha_log = jnp.zeros((C,), dtype=jnp.float32)
    out2 = jax.block_until_ready(snake(x, alpha_log, alpha_logscale=True))
    ref2 = ref_snake(np.asarray(x, np.float64), np.asarray(alpha_log, np.float64),
                     alpha_logscale=True)
    np.testing.assert_allclose(np.asarray(out2), ref2, rtol=1e-5, atol=1e-5)

    # Ragged time edge (cdiv grid, masked edge stores) with a forced small tile.
    T2 = 200
    x3 = jax.random.normal(kx, (B, C, T2), dtype=jnp.float32)
    out3 = jax.block_until_ready(snake(x3, alpha, max_time_tile=128))
    ref3 = ref_snake(np.asarray(x3, np.float64), np.asarray(alpha, np.float64))
    np.testing.assert_allclose(np.asarray(out3), ref3, rtol=1e-5, atol=1e-5)

    # bf16 I/O path (math still f32 inside the kernel).
    x_bf16 = x3.astype(jnp.bfloat16)
    out4 = jax.block_until_ready(snake(x_bf16, alpha, max_time_tile=128))
    ref4 = ref_snake(np.asarray(x_bf16, np.float64), np.asarray(alpha, np.float64))
    np.testing.assert_allclose(np.asarray(out4, np.float64), ref4,
                               rtol=2e-2, atol=2e-2)

    print("KERNEL_OK")
</pallas_src>

<mosaic_0001>
module attributes {stable_mosaic.version = 11 : i64} {
  func.func @_snake_kernel(%arg0: i32, %arg1: i32, %arg2: memref<8x16xf32, #tpu.memory_space<vmem>>, %arg3: memref<8x1xf32, #tpu.memory_space<vmem>>, %arg4: memref<8x16xf32, #tpu.memory_space<vmem>>) attributes {dimension_semantics = [#tpu.dimension_semantics<parallel>, #tpu.dimension_semantics<parallel>], iteration_bounds = array<i64: 1, 1>, scalar_prefetch = 0 : i64, scratch_operands = 0 : i64, tpu.core_type = #tpu.core_type<tc>, window_params = [{transform_indices = @transform_0, window_bounds = array<i64: 8, 16>}, {transform_indices = @transform_1, window_bounds = array<i64: 8, 1>}, {transform_indices = @transform_2, window_bounds = array<i64: 8, 16>}]} {
    %c0 = arith.constant 0 : index
    %c0_0 = arith.constant 0 : index
    %0 = vector.load %arg2[%c0, %c0_0] : memref<8x16xf32, #tpu.memory_space<vmem>>, vector<8x16xf32>
    %c0_1 = arith.constant 0 : index
    %c0_2 = arith.constant 0 : index
    %1 = vector.load %arg3[%c0_1, %c0_2] : memref<8x1xf32, #tpu.memory_space<vmem>>, vector<8x1xf32>
    %cst = arith.constant 9.99999971E-10 : f32
    %2 = vector.broadcast %cst : f32 to vector<8x1xf32>
    %3 = arith.addf %1, %2 : vector<8x1xf32>
    %cst_3 = arith.constant 1.000000e+00 : f32
    %4 = vector.broadcast %cst_3 : f32 to vector<8x1xf32>
    %5 = arith.divf %4, %3 : vector<8x1xf32>
    %6 = vector.broadcast %1 : vector<8x1xf32> to vector<8x16xf32>
    %7 = arith.mulf %0, %6 : vector<8x16xf32>
    %8 = math.sin %7 : vector<8x16xf32>
    %9 = arith.mulf %8, %8 : vector<8x16xf32>
    %10 = vector.broadcast %5 : vector<8x1xf32> to vector<8x16xf32>
    %11 = arith.mulf %10, %9 : vector<8x16xf32>
    %12 = arith.addf %0, %11 : vector<8x16xf32>
    %c0_4 = arith.constant 0 : index
    %c0_5 = arith.constant 0 : index
    %13 = vector.load %arg4[%c0_4, %c0_5] : memref<8x16xf32, #tpu.memory_space<vmem>>, vector<8x16xf32>
    tpu.vector_store %arg4[%c0_4, %c0_5], %12 {strides = array<i32>} : memref<8x16xf32, #tpu.memory_space<vmem>>, vector<8x16xf32>,
    return
  }
  func.func @transform_0(%arg0: i32, %arg1: i32) -> (i32, i32) {
    %c0_i32 = arith.constant 0 : i32
    return %arg0, %arg1 : i32, i32
  }
  func.func @transform_1(%arg0: i32, %arg1: i32) -> (i32, i32) {
    %c0_i32 = arith.constant 0 : i32
    %c0_i32_0 = arith.constant 0 : i32
    return %arg0, %c0_i32 : i32, i32
  }
  func.func @transform_2(%arg0: i32, %arg1: i32) -> (i32, i32) {
    %c0_i32 = arith.constant 0 : i32
    return %arg0, %arg1 : i32, i32
  }
}

</mosaic_0001>

<bundles_post_ra>
// kernel: tpu_custom_call.1
= control target key start
LH: loop header
LB: loop body
LE: loop exit
PB: predicated region body
PF: predicated region fallthrough
CT: control target
= control target key end

     0   :  { %v198_v1 = vmov 0   ;;  %s264_s0 = inlined_call_operand.vmem [shape: f32[8,16], index: 0, kind: input, shape index: {}]   ;;  %s265_s1 = inlined_call_operand.vmem [shape: f32[8,1], index: 1, kind: input, shape index: {}]   ;;  %s266_s2 = inlined_call_operand.hbm [shape: f32[8,16], index: 2, kind: output, shape index: {}]  }
   0x1   :  { %v13_v0 = vld [vmem:[%s265_s1] sm:$0xff]  ;;  %167 = vset.pattern.permute.xlu0 %v198_v1 }
   0x2   :  { %v14_v2 = vadd.f32 1e-09, %v13_v0  ;;  %19 = vperm.xlu0 %167, %v13_v0  }
   0x4   :  { %168 = vrcp.f32 %v14_v2 }
   0x5   :  { %7 = vsyncpa [#allocation3], 0  ;;  %v227_v4 = vld [vmem:[%s264_s0] sm:$0xff]  ;;  %v199_v17 = vmov 683565275   ;;  %s205_s0 = smov [#allocation2]  }
   0x6   :  { %v200_v19 = vmov 2475754826   ;;  %v201_v22 = vmov 2131351028   ;;  %v202_v25 = vmov 2102212464  }
   0x7   :  { %v203_v28 = vmov 920167782   ;;  %v204_v31 = vmov 1326507024   ;;  %s143_s1 = sshll.u32 %s205_s0, 4  ;;  %vm135_vm13 = vcmask 130048   ;;  %s144_s1 = int_to_ptr.vmem [resolvable:$true] %s143_s1 }
   0x8   :  { %s174_s13 = scalar_lea.vmem %s144_s1, 128  ;;  %p179_p1 = scmp.lt.s32.totalorder %s144_s1, %s144_s1 }
   0x9   :  { %p175_p0 = scmp.ne.s32.totalorder %s144_s1, %s174_s13  ;;  %p180_p2 = scmp.lt.s32.totalorder %s174_s13, %s174_s13 }
   0xb   :  { %p181_p3 = por %p180_p2, %p179_p1 }
   0xd   :  { %p182_p4 = pnand %p181_p3, %p175_p0 }
   0xe   :  { %v169_v3 = vpop.eup %168 }
   0xf   :  { %130 = vperm.xlu0 %167, %v169_v3  }
  0x81   :  { %v20_v5 = vpop.permute.xlu0 %19 }
  0x82   :  { %v230_v6 = vmul.f32 %v20_v5, %v227_v4 }
  0x84   :  { %v26_v7 = vand.u32 2139095040, %v230_v6  ;;  %v23_v11 = vand.u32 2147483647, %v230_v6  ;;  %vm25_vm7 = vcmp.lt.s32.totalorder %v230_v6, 0  ;;  %vm115_vm12 = vweird.f32 %v230_v6 }
  0x86   :  { %v27_v8 = vshrl.u32 %v26_v7, 23  ;;  %v30_v14 = vand.u32 8388607, %v23_v11  ;;  %vm24_vm8 = vcmp.le.f32.partialorder %v23_v11, 0.7853982 }
  0x88   :  { %v151_v9 = vadd.s32 4294967169, %v27_v8  ;;  %v31_v33 = vor.u32 8388608, %v30_v14 }
  0x8a   :  { %v33_v10 = vadd.s32 1, %v151_v9  ;;  %v71_v47 = vshll.u32 %v31_v33, 8 }
  0x8c   :  { %vm34_vm0 = vcmp.gt.s32.totalorder %v33_v10, 0 }
  0x8d   :  { %v35_v12 = vsel %vm34_vm0, %v33_v10, 0 }
  0x8e   :  { %v37_v13 = vand.u32 31, %v35_v12  ;;  %v36_v16 = vshrl.u32 %v35_v12, 5 }
  0x90   :  { %v38_v15 = vsub.s32 32, %v37_v13  ;;  %v40_v18 = vshll.u32 %v199_v17, %v37_v13  ;;  %v43_v20 = vshll.u32 %v200_v19, %v37_v13  ;;  %v46_v24 = vshll.u32 %v201_v22, %v37_v13 }
  0x91   :  { %v49_v27 = vshll.u32 %v202_v25, %v37_v13  ;;  %v52_v30 = vshll.u32 %v203_v28, %v37_v13  ;;  %vm55_vm1 = vcmp.lt.s32.totalorder %v36_v16, 1  ;;  %vm58_vm2 = vcmp.lt.s32.totalorder %v36_v16, 4 }
  0x92   :  { %v41_v21 = vshrl.u32 %v200_v19, %v38_v15  ;;  %v44_v23 = vshrl.u32 %v201_v22, %v38_v15  ;;  %v47_v26 = vshrl.u32 %v202_v25, %v38_v15  ;;  %v50_v29 = vshrl.u32 %v203_v28, %v38_v15 }
  0x93   :  { %v53_v32 = vshrl.u32 %v204_v31, %v38_v15  ;;  %v39_v42 = vshrl.u32 %v199_v17, %v38_v15  ;;  %vm57_vm3 = vcmp.lt.s32.totalorder %v36_v16, 3  ;;  %vm56_vm4 = vcmp.lt.s32.totalorder %v36_v16, 2 }
  0x94   :  { %v42_v34 = vor.u32 %v41_v21, %v40_v18  ;;  %v45_v35 = vor.u32 %v44_v23, %v43_v20  ;;  %v48_v36 = vor.u32 %v47_v26, %v46_v24  ;;  %v51_v37 = vor.u32 %v50_v29, %v49_v27 }
  0x95   :  { %v54_v38 = vor.u32 %v53_v32, %v52_v30 }
  0x96   :  { %v60_v39 = vsel %vm58_vm2, %v48_v36, 2102212464  ;;  %v63_v40 = vsel %vm55_vm1, %v42_v34, %v45_v35  ;;  %v67_v41 = vsel %vm55_vm1, %v45_v35, %v48_v36  ;;  %v64_v43 = vsel %vm58_vm2, %v51_v37, 920167782 }
  0x97   :  { %v68_v44 = vsel %vm58_vm2, %v54_v38, 1326507024  ;;  %v65_v45 = vsel %vm57_vm3, %v48_v36, %v64_v43  ;;  %v59_v48 = vsel %vm55_vm1, %v39_v42, %v42_v34  ;;  %v61_v49 = vsel %vm57_vm3, %v45_v35, %v60_v39 }
  0x98   :  { %v69_v46 = vsel %vm57_vm3, %v51_v37, %v68_v44  ;;  %v66_v50 = vsel %vm56_vm4, %v63_v40, %v65_v45  ;;  %v62_v56 = vsel %vm56_vm4, %v59_v48, %v61_v49  ;;  %v131_v37 = vpop.permute.xlu0 %130 }
  0x99   :  { %v70_v51 = vsel %vm56_vm4, %v67_v41, %v69_v46  ;;  %v239_v54 = vmul.u32.u64.low %v71_v47, %v66_v50  ;;  %v240_v55 = vmul.u32.u64.high %v71_v47, %v66_v50, %v239_v54  ;;  %v78_v58 = vmul.u32 %v71_v47, %v62_v56 }
  0x9a   :  { %v236_v52 = vmul.u32.u64.low %v71_v47, %v70_v51  ;;  %v237_v53 = vmul.u32.u64.high %v71_v47, %v70_v51, %v236_v52 }
  0x9b   :  { %v81_v57 = vadd.s32 1, %v240_v55 }
  0x9c   :  { %vm80_vm5 = vc.u32 %v237_v53, %v239_v54  ;;  %v79_v8 = vadd.s32 %v239_v54, %v237_v53 }
  0x9d   :  { %v82_v59 = vsel %vm80_vm5, %v81_v57, %v240_v55 }
  0x9e   :  { %v83_v60 = vadd.s32 %v82_v59, %v78_v58 }
  0xa0   :  { %v84_v61 = vadd.s32 536870912, %v83_v60 }
  0xa2   :  { %v85_v62 = vshrl.u32 %v84_v61, 30 }
  0xa4   :  { %v86_v63 = vshll.u32 %v85_v62, 30  ;;  %v109_v21 = vsub.s32 4, %v85_v62 }
  0xa6   :  { %v87_v0 = vsub.s32 %v83_v60, %v86_v63  ;;  %v110_v24 = vsel %vm25_vm7, %v109_v21, %v85_v62 }
  0xa7   :  { %v112_v26 = vsel %vm24_vm8, 0, %v110_v24 }
  0xa8   :  { %v89_v1 = vsub.s32 0, %v87_v0  ;;  %v116_v27 = vadd.s32 3, %v112_v26 }
  0xaa   :  { %v152_v2 = vmin.u32 %v89_v1, %v87_v0  ;;  %v117_v28 = vand.u32 3, %v116_v27 }
  0xac   :  { %v91_v3 = vclz %v152_v2  ;;  %vm122_vm9 = vcmp.eq.s32.totalorder %v117_v28, 2  ;;  %vm119_vm10 = vcmp.eq.s32.totalorder %v117_v28, 0  ;;  %vm118_vm11 = vcmp.lt.s32.totalorder %v117_v28, 2 }
  0xae   :  { %v153_v5 = vadd.s32 4294967294, %v91_v3 }
  0xb0   :  { %vm154_vm6 = vcmp.lt.s32.totalorder %v153_v5, 0 }
  0xb1   :  { %v94_v7 = vsel %vm154_vm6, 0, %v153_v5 }
  0xb2   :  { %v95_v9 = vsub.s32 32, %v94_v7  ;;  %v99_v10 = vsub.s32 4294967266, %v94_v7  ;;  %v96_v12 = vshll.u32 %v87_v0, %v94_v7 }
  0xb4   :  { %v97_v13 = vshrl.u32 %v79_v8, %v95_v9  ;;  %v100_v14 = vadd.s32 127, %v99_v10 }
  0xb6   :  { %v98_v15 = vor.u32 %v97_v13, %v96_v12  ;;  %v101_v16 = vshll.u32 %v100_v14, 23 }
  0xb8   :  { %v102_v17 = vor.u32 4788187, %v101_v16  ;;  %v105_v19 = vcvt.s32.f32 %v98_v15 }
  0xba   :  { %v103_v18 = vand.u32 2147483647, %v102_v17 }
  0xbc   :  { %v106_v20 = vmul.f32 %v105_v19, %v103_v18 }
  0xbe   :  { %v107_v22 = vxor.u32 2147483648, %v106_v20 }
  0xc0   :  { %v108_v23 = vsel %vm25_vm7, %v107_v22, %v106_v20 }
  0xc1   :  { %v111_v25 = vsel %vm24_vm8, %v230_v6, %v108_v23 }
  0xc2   :  { %170 = vcosq.f32 %v111_v25 }
  0xc3   :  { %172 = vsinq.f32 %v111_v25 }
  0xcc   :  { %v171_v29 = vpop.eup %170 }
  0xcd   :  { %v173_v30 = vpop.eup %172  ;;  %v123_v31 = vxor.u32 2147483648, %v171_v29 }
  0xce   :  { %v120_v32 = vxor.u32 2147483648, %v173_v30 }
  0xcf   :  { %v124_v33 = vsel %vm122_vm9, %v123_v31, %v173_v30 }
  0xd0   :  { %v121_v34 = vsel %vm119_vm10, %v171_v29, %v120_v32 }
  0xd1   :  { %v125_v11 = vsel %vm118_vm11, %v121_v34, %v124_v33 }
  0xd2   :  { %v126_v35 = vsel %vm115_vm12, nan, %v125_v11 }
  0xd3   :  { %v127_v36 = vmul.f32 %v126_v35, %v126_v35 }
  0xd5   :  { %v133_v38 = vmul.f32 %v131_v37, %v127_v36 }
  0xd7   :  { %v134_v39 = vadd.f32 %v133_v38, %v227_v4 }
  0xd9   :  { %136 = vst.msk [vmem:[#allocation2] sm:$0xff] %vm135_vm13, %v134_v39 }
  0xda   :  { %185 = shalt.err (!%p182_p4)
}
  0xdb   :  { %s186_s16 = scalar_lea.hbm %s266_s2, 128 }
  0xdc   :  { %p187_p5 = scmp.ne.s32.totalorder %s266_s2, %s186_s16  ;;  %p190_p6 = scmp.lt.u32.totalorder %s186_s16, %s266_s2 }
  0xde   :  { %p192_p7 = pnand %p190_p6, %p187_p5 }
  0xe0   :  { %195 = shalt.err (!%p192_p7)
}
  0xe1   :  { %146 = dma.vmem_to_hbm [thread:$0]  %s144_s1, 128, %s266_s2, [#allocation3]  }
  0xe2   :  { %196 = dma.done.wait [#allocation3], 128  }
  0xe3   :  { %197 = vsyncadd [#allocation3], 4294967168 }
  0xe4   :  { %150 = vsyncpa [#allocation3], 1 }

</bundles_post_ra>
